<compile_context>
chip_gen: v7x
topology: tpu7x:2x2x1
jax: 0.10.0
libtpu: 0.0.40
codegen_flags: <defaults>
</compile_context>

<pallas_src>
import math
from functools import partial

import jax
import jax.numpy as jnp
from jax.experimental import pallas as pl
from jax.experimental.pallas import tpu as pltpu

EPS = 1e-6


# ----------------------------- helpers -----------------------------

def _round_up(x, m):
    return ((x + m - 1) // m) * m


def _pick_block_rows(mp, d, d_ff, budget_bytes=24 << 20):
    """Largest row-tile (multiple of 8) dividing mp that fits the VMEM budget,
    preferring a grid of >= 2 steps (v7x has 2 TensorCores)."""
    best = min(8, mp)
    for c in (1024, 512, 256, 128, 64, 32, 16, 8):
        if mp % c:
            continue
        est = 4 * c * (2 * d + d_ff) * 3  # rough f32 working-set estimate
        if est > budget_bytes:
            continue
        if mp // c >= 2:
            return c
        best = max(best, min(c, mp))
    return min(best, mp)


def _vmem_limit_bytes(tm, d, d_ff):
    est = 4 * (2 * tm * d            # x tile (double-buffered)
               + 2 * tm * d          # out tile (double-buffered)
               + tm * d_ff           # hidden activation
               + 2 * (d * d_ff + d_ff * d + 2 * d_ff + 4 * d))
    # explicit, bounded for v7x (64 MiB physical / 32 MiB scoped default)
    return int(min(max(est + (4 << 20), 8 << 20), 48 << 20))


def _flatten_rows(x):
    d = x.shape[-1]
    m = 1
    for s in x.shape[:-1]:
        m *= s
    return x.reshape(m, d), x.shape, m, d


def _pad_rows(x2d, mp):
    m = x2d.shape[0]
    if mp == m:
        return x2d
    return jnp.pad(x2d, ((0, mp - m), (0, 0)))


def _layernorm_rows(x, a, b, eps):
    """LayerNorm over last dim, matching torch: unbiased std, eps added to std."""
    d = x.shape[-1]
    mean = jnp.mean(x, axis=-1, keepdims=True)
    var = jnp.sum((x - mean) ** 2, axis=-1, keepdims=True) * (1.0 / (d - 1))
    std = jnp.sqrt(var)
    inv = pl.reciprocal(std + eps, approx=True)   # EUP slot, not a VALU divide
    return a * (x - mean) * inv + b


# ----------------------------- fused kernel: x + FFN(LN(x)) -----------------------------

def _sublayer_ffn_kernel(x_ref, a_ref, b_ref, w1_ref, b1_ref, w2_ref, b2_ref,
                         o_ref, *, eps, use_bf16_mxu):
    x = x_ref[...]                                   # (tm, D) f32
    h = _layernorm_rows(x, a_ref[...], b_ref[...], eps)

    # sublayer = position-wise FFN; dropout = identity (eval mode)
    if use_bf16_mxu:
        lhs1, rhs1 = h.astype(jnp.bfloat16), w1_ref[...].astype(jnp.bfloat16)
    else:
        lhs1, rhs1 = h, w1_ref[...]
    y = jnp.dot(lhs1, rhs1, preferred_element_type=jnp.float32) + b1_ref[...]
    y = jnp.maximum(y, 0.0)

    if use_bf16_mxu:
        lhs2, rhs2 = y.astype(jnp.bfloat16), w2_ref[...].astype(jnp.bfloat16)
    else:
        lhs2, rhs2 = y, w2_ref[...]
    z = jnp.dot(lhs2, rhs2, preferred_element_type=jnp.float32) + b2_ref[...]

    o_ref[...] = x + z                               # residual fused into the same kernel


def sublayer_ffn(x, ln_a, ln_b, w1, b1, w2, b2, eps=EPS, use_bf16_mxu=False):
    """Fused SublayerConnection with a position-wise FFN sublayer.

    x: (..., D);  w1: (D, D_FF);  w2: (D_FF, D).  Returns same shape as x.
    Note: D and D_FF are kept whole per block (LayerNorm needs full D per row and
    the demo sizes fit VMEM easily); for very large D_FF an additional K/N grid
    axis with a VMEM accumulator would be added.
    """
    x2d, orig_shape, m, d = _flatten_rows(x)
    d_ff = w1.shape[1]
    mp = _round_up(m, 8)
    x2d = _pad_rows(x2d, mp)
    tm = _pick_block_rows(mp, d, d_ff)
    grid = (mp // tm,)

    out = pl.pallas_call(
        partial(_sublayer_ffn_kernel, eps=eps, use_bf16_mxu=use_bf16_mxu),
        out_shape=jax.ShapeDtypeStruct((mp, d), jnp.float32),
        grid=grid,
        in_specs=[
            pl.BlockSpec((tm, d), lambda i: (i, 0)),          # x tile
            pl.BlockSpec((1, d), lambda i: (0, 0)),           # ln a_2
            pl.BlockSpec((1, d), lambda i: (0, 0)),           # ln b_2
            pl.BlockSpec((d, d_ff), lambda i: (0, 0)),        # w1 (loaded once)
            pl.BlockSpec((1, d_ff), lambda i: (0, 0)),        # b1
            pl.BlockSpec((d_ff, d), lambda i: (0, 0)),        # w2 (loaded once)
            pl.BlockSpec((1, d), lambda i: (0, 0)),           # b2
        ],
        out_specs=pl.BlockSpec((tm, d), lambda i: (i, 0)),
        compiler_params=pltpu.CompilerParams(
            dimension_semantics=("parallel",),
            vmem_limit_bytes=_vmem_limit_bytes(tm, d, d_ff)),
    )(x2d, ln_a.reshape(1, d), ln_b.reshape(1, d),
      w1, b1.reshape(1, d_ff), w2, b2.reshape(1, d))

    return out[:m].reshape(orig_shape)


# ----------------------------- generic SublayerConnection path -----------------------------
# Keeps the module's "sublayer is an arbitrary callable" semantics: tiled LayerNorm
# kernel -> arbitrary JAX sublayer -> tiled residual-add kernel.

def _layernorm_kernel(x_ref, a_ref, b_ref, o_ref, *, eps):
    o_ref[...] = _layernorm_rows(x_ref[...], a_ref[...], b_ref[...], eps)


def layernorm(x, a, b, eps=EPS):
    x2d, orig_shape, m, d = _flatten_rows(x)
    mp = _round_up(m, 8)
    x2d = _pad_rows(x2d, mp)
    tm = _pick_block_rows(mp, d, 0)
    out = pl.pallas_call(
        partial(_layernorm_kernel, eps=eps),
        out_shape=jax.ShapeDtypeStruct((mp, d), jnp.float32),
        grid=(mp // tm,),
        in_specs=[
            pl.BlockSpec((tm, d), lambda i: (i, 0)),
            pl.BlockSpec((1, d), lambda i: (0, 0)),
            pl.BlockSpec((1, d), lambda i: (0, 0)),
        ],
        out_specs=pl.BlockSpec((tm, d), lambda i: (i, 0)),
        compiler_params=pltpu.CompilerParams(
            dimension_semantics=("parallel",),
            vmem_limit_bytes=_vmem_limit_bytes(tm, d, 0)),
    )(x2d, a.reshape(1, d), b.reshape(1, d))
    return out[:m].reshape(orig_shape)


def _residual_add_kernel(x_ref, y_ref, o_ref):
    o_ref[...] = x_ref[...] + y_ref[...]


def residual_add(x, y):
    x2d, orig_shape, m, d = _flatten_rows(x)
    y2d, _, _, _ = _flatten_rows(y)
    mp = _round_up(m, 8)
    x2d, y2d = _pad_rows(x2d, mp), _pad_rows(y2d, mp)
    tm = _pick_block_rows(mp, d, 0)
    out = pl.pallas_call(
        _residual_add_kernel,
        out_shape=jax.ShapeDtypeStruct((mp, d), jnp.float32),
        grid=(mp // tm,),
        in_specs=[
            pl.BlockSpec((tm, d), lambda i: (i, 0)),
            pl.BlockSpec((tm, d), lambda i: (i, 0)),
        ],
        out_specs=pl.BlockSpec((tm, d), lambda i: (i, 0)),
        compiler_params=pltpu.CompilerParams(
            dimension_semantics=("parallel",),
            vmem_limit_bytes=_vmem_limit_bytes(tm, d, 0)),
    )(x2d, y2d)
    return out[:m].reshape(orig_shape)


def sublayer_connection(x, sublayer_fn, ln_a, ln_b, eps=EPS):
    """Faithful generic SublayerConnection: x + dropout(sublayer(norm(x))), dropout=identity."""
    h = layernorm(x, ln_a, ln_b, eps)
    return residual_add(x, sublayer_fn(h))


# ----------------------------- main -----------------------------

if __name__ == "__main__":
    # Small but lane-dense shapes (D, D_FF multiples of 128 per review feedback).
    B, T, D, D_FF = 2, 8, 128, 256

    key = jax.random.PRNGKey(0)
    kx, k1, k2, k3, k4 = jax.random.split(key, 5)

    x = jax.random.normal(kx, (B, T, D), jnp.float32)

    # LayerNorm init: a_2 = ones, b_2 = zeros (as in the PyTorch module)
    ln_a = jnp.ones((D,), jnp.float32)
    ln_b = jnp.zeros((D,), jnp.float32)

    # canonical sublayer: position-wise FFN (Linear -> ReLU -> Linear)
    w1 = jax.random.normal(k1, (D, D_FF), jnp.float32) * (1.0 / math.sqrt(D))
    b1 = jax.random.normal(k2, (D_FF,), jnp.float32) * 0.01
    w2 = jax.random.normal(k3, (D_FF, D), jnp.float32) * (1.0 / math.sqrt(D_FF))
    b2 = jax.random.normal(k4, (D,), jnp.float32) * 0.01

    # fused single-kernel path
    out = jax.block_until_ready(sublayer_ffn(x, ln_a, ln_b, w1, b1, w2, b2))

    # pure-JAX reference (dropout = identity in eval mode)
    def ref(xr):
        mean = xr.mean(-1, keepdims=True)
        var = ((xr - mean) ** 2).sum(-1, keepdims=True) / (D - 1)
        std = jnp.sqrt(var)
        h = ln_a * (xr - mean) / (std + EPS) + ln_b
        y = jnp.maximum(h @ w1 + b1, 0.0) @ w2 + b2
        return xr + y

    r = ref(x)
    assert out.shape == (B, T, D)
    assert bool(jnp.all(jnp.isfinite(out)))
    assert bool(jnp.allclose(out, r, atol=5e-2, rtol=5e-2))

    # generic SublayerConnection API (arbitrary JAX sublayer callable)
    out2 = jax.block_until_ready(sublayer_connection(
        x, lambda h: jnp.maximum(h @ w1 + b1, 0.0) @ w2 + b2, ln_a, ln_b))
    assert bool(jnp.allclose(out2, r, atol=5e-2, rtol=5e-2))

    # bf16 MXU operands with f32 accumulation (v6e/v7x feedback) — sanity check only
    out3 = jax.block_until_ready(
        sublayer_ffn(x, ln_a, ln_b, w1, b1, w2, b2, use_bf16_mxu=True))
    assert bool(jnp.all(jnp.isfinite(out3)))

    print("KERNEL_OK")
</pallas_src>

<mosaic_0001>
module attributes {stable_mosaic.version = 11 : i64} {
  func.func @_sublayer_ffn_kernel(%arg0: i32, %arg1: memref<8x128xf32, #tpu.memory_space<vmem>>, %arg2: memref<1x128xf32, #tpu.memory_space<vmem>>, %arg3: memref<1x128xf32, #tpu.memory_space<vmem>>, %arg4: memref<128x256xf32, #tpu.memory_space<vmem>>, %arg5: memref<1x256xf32, #tpu.memory_space<vmem>>, %arg6: memref<256x128xf32, #tpu.memory_space<vmem>>, %arg7: memref<1x128xf32, #tpu.memory_space<vmem>>, %arg8: memref<8x128xf32, #tpu.memory_space<vmem>>) attributes {dimension_semantics = [#tpu.dimension_semantics<parallel>], iteration_bounds = array<i64: 2>, scalar_prefetch = 0 : i64, scratch_operands = 0 : i64, tpu.core_type = #tpu.core_type<tc>, window_params = [{transform_indices = @transform_0, window_bounds = array<i64: 8, 128>}, {pipeline_mode = #tpu.pipeline_mode<synchronous>, transform_indices = @transform_1, window_bounds = array<i64: 1, 128>}, {pipeline_mode = #tpu.pipeline_mode<synchronous>, transform_indices = @transform_2, window_bounds = array<i64: 1, 128>}, {pipeline_mode = #tpu.pipeline_mode<synchronous>, transform_indices = @transform_3, window_bounds = array<i64: 128, 256>}, {pipeline_mode = #tpu.pipeline_mode<synchronous>, transform_indices = @transform_4, window_bounds = array<i64: 1, 256>}, {pipeline_mode = #tpu.pipeline_mode<synchronous>, transform_indices = @transform_5, window_bounds = array<i64: 256, 128>}, {pipeline_mode = #tpu.pipeline_mode<synchronous>, transform_indices = @transform_6, window_bounds = array<i64: 1, 128>}, {transform_indices = @transform_7, window_bounds = array<i64: 8, 128>}]} {
    %c0 = arith.constant 0 : index
    %c0_0 = arith.constant 0 : index
    %0 = vector.load %arg1[%c0, %c0_0] : memref<8x128xf32, #tpu.memory_space<vmem>>, vector<8x128xf32>
    %c0_1 = arith.constant 0 : index
    %c0_2 = arith.constant 0 : index
    %1 = vector.load %arg2[%c0_1, %c0_2] : memref<1x128xf32, #tpu.memory_space<vmem>>, vector<1x128xf32>
    %c0_3 = arith.constant 0 : index
    %c0_4 = arith.constant 0 : index
    %2 = vector.load %arg3[%c0_3, %c0_4] : memref<1x128xf32, #tpu.memory_space<vmem>>, vector<1x128xf32>
    %cst = arith.constant dense<0.000000e+00> : vector<8xf32>
    %3 = vector.multi_reduction <add>, %0, %cst [1] : vector<8x128xf32> to vector<8xf32>
    %4 = vector.shape_cast %3 : vector<8xf32> to vector<8x1xf32>
    %cst_5 = arith.constant 1.280000e+02 : f32
    %5 = vector.broadcast %cst_5 : f32 to vector<8x1xf32>
    %6 = arith.divf %4, %5 : vector<8x1xf32>
    %7 = vector.broadcast %6 : vector<8x1xf32> to vector<8x128xf32>
    %8 = arith.subf %0, %7 : vector<8x128xf32>
    %9 = arith.mulf %8, %8 : vector<8x128xf32>
    %cst_6 = arith.constant dense<0.000000e+00> : vector<8xf32>
    %10 = vector.multi_reduction <add>, %9, %cst_6 [1] : vector<8x128xf32> to vector<8xf32>
    %11 = vector.shape_cast %10 : vector<8xf32> to vector<8x1xf32>
    %cst_7 = arith.constant 0.00787401571 : f32
    %12 = vector.broadcast %cst_7 : f32 to vector<8x1xf32>
    %13 = arith.mulf %11, %12 : vector<8x1xf32>
    %14 = math.sqrt %13 : vector<8x1xf32>
    %cst_8 = arith.constant 9.99999997E-7 : f32
    %15 = vector.broadcast %cst_8 : f32 to vector<8x1xf32>
    %16 = arith.addf %14, %15 : vector<8x1xf32>
    %17 = tpu.reciprocal %16 {approx = true} : vector<8x1xf32> -> vector<8x1xf32>
    %18 = vector.broadcast %6 : vector<8x1xf32> to vector<8x128xf32>
    %19 = arith.subf %0, %18 : vector<8x128xf32>
    %20 = vector.broadcast %1 : vector<1x128xf32> to vector<8x128xf32>
    %21 = arith.mulf %20, %19 : vector<8x128xf32>
    %22 = vector.broadcast %17 : vector<8x1xf32> to vector<8x128xf32>
    %23 = arith.mulf %21, %22 : vector<8x128xf32>
    %24 = vector.broadcast %2 : vector<1x128xf32> to vector<8x128xf32>
    %25 = arith.addf %23, %24 : vector<8x128xf32>
    %c0_9 = arith.constant 0 : index
    %c0_10 = arith.constant 0 : index
    %26 = vector.load %arg4[%c0_9, %c0_10] : memref<128x256xf32, #tpu.memory_space<vmem>>, vector<128x256xf32>
    %cst_11 = arith.constant dense<0.000000e+00> : vector<8x256xf32>
    %27 = tpu.matmul %25, %26, %cst_11 {dimension_numbers = #tpu.dot_dimension_numbers<[1], [0], [0], [1], [0, 0, 1, 1], [], []>} : vector<8x128xf32>, vector<128x256xf32>, vector<8x256xf32> -> vector<8x256xf32>
    %c0_12 = arith.constant 0 : index
    %c0_13 = arith.constant 0 : index
    %28 = vector.load %arg5[%c0_12, %c0_13] : memref<1x256xf32, #tpu.memory_space<vmem>>, vector<1x256xf32>
    %29 = vector.broadcast %28 : vector<1x256xf32> to vector<8x256xf32>
    %30 = arith.addf %27, %29 : vector<8x256xf32>
    %cst_14 = arith.constant 0.000000e+00 : f32
    %31 = vector.broadcast %cst_14 : f32 to vector<8x256xf32>
    %32 = arith.maximumf %30, %31 : vector<8x256xf32>
    %c0_15 = arith.constant 0 : index
    %c0_16 = arith.constant 0 : index
    %33 = vector.load %arg6[%c0_15, %c0_16] : memref<256x128xf32, #tpu.memory_space<vmem>>, vector<256x128xf32>
    %cst_17 = arith.constant dense<0.000000e+00> : vector<8x128xf32>
    %34 = tpu.matmul %32, %33, %cst_17 {dimension_numbers = #tpu.dot_dimension_numbers<[1], [0], [0], [1], [0, 0, 1, 1], [], []>} : vector<8x256xf32>, vector<256x128xf32>, vector<8x128xf32> -> vector<8x128xf32>
    %c0_18 = arith.constant 0 : index
    %c0_19 = arith.constant 0 : index
    %35 = vector.load %arg7[%c0_18, %c0_19] : memref<1x128xf32, #tpu.memory_space<vmem>>, vector<1x128xf32>
    %36 = vector.broadcast %35 : vector<1x128xf32> to vector<8x128xf32>
    %37 = arith.addf %34, %36 : vector<8x128xf32>
    %38 = arith.addf %0, %37 : vector<8x128xf32>
    %c0_20 = arith.constant 0 : index
    %c0_21 = arith.constant 0 : index
    %39 = vector.load %arg8[%c0_20, %c0_21] : memref<8x128xf32, #tpu.memory_space<vmem>>, vector<8x128xf32>
    tpu.vector_store %arg8[%c0_20, %c0_21], %38 {strides = array<i32>} : memref<8x128xf32, #tpu.memory_space<vmem>>, vector<8x128xf32>,
    return
  }
  func.func @transform_0(%arg0: i32) -> (i32, i32) {
    %c0_i32 = arith.constant 0 : i32
    %c0_i32_0 = arith.constant 0 : i32
    return %arg0, %c0_i32 : i32, i32
  }
  func.func @transform_1(%arg0: i32) -> (i32, i32) {
    %c0_i32 = arith.constant 0 : i32
    %c0_i32_0 = arith.constant 0 : i32
    %c0_i32_1 = arith.constant 0 : i32
    return %c0_i32, %c0_i32_0 : i32, i32
  }
  func.func @transform_2(%arg0: i32) -> (i32, i32) {
    %c0_i32 = arith.constant 0 : i32
    %c0_i32_0 = arith.constant 0 : i32
    %c0_i32_1 = arith.constant 0 : i32
    return %c0_i32, %c0_i32_0 : i32, i32
  }
  func.func @transform_3(%arg0: i32) -> (i32, i32) {
    %c0_i32 = arith.constant 0 : i32
    %c0_i32_0 = arith.constant 0 : i32
    %c0_i32_1 = arith.constant 0 : i32
    return %c0_i32, %c0_i32_0 : i32, i32
  }
  func.func @transform_4(%arg0: i32) -> (i32, i32) {
    %c0_i32 = arith.constant 0 : i32
    %c0_i32_0 = arith.constant 0 : i32
    %c0_i32_1 = arith.constant 0 : i32
    return %c0_i32, %c0_i32_0 : i32, i32
  }
  func.func @transform_5(%arg0: i32) -> (i32, i32) {
    %c0_i32 = arith.constant 0 : i32
    %c0_i32_0 = arith.constant 0 : i32
    %c0_i32_1 = arith.constant 0 : i32
    return %c0_i32, %c0_i32_0 : i32, i32
  }
  func.func @transform_6(%arg0: i32) -> (i32, i32) {
    %c0_i32 = arith.constant 0 : i32
    %c0_i32_0 = arith.constant 0 : i32
    %c0_i32_1 = arith.constant 0 : i32
    return %c0_i32, %c0_i32_0 : i32, i32
  }
  func.func @transform_7(%arg0: i32) -> (i32, i32) {
    %c0_i32 = arith.constant 0 : i32
    %c0_i32_0 = arith.constant 0 : i32
    return %arg0, %c0_i32 : i32, i32
  }
}

</mosaic_0001>

<bundles_post_ra>
// kernel: tpu_custom_call.1
= control target key start
LH: loop header
LB: loop body
LE: loop exit
PB: predicated region body
PF: predicated region fallthrough
CT: control target
= control target key end

     0   :  { %12 = vsyncpa [#allocation3], 0  ;;  %s1346_s0 = inlined_call_operand.hbm [shape: f32[16,128], index: 0, kind: input, shape index: {}]   ;;  %s1347_s1 = inlined_call_operand.vmem [shape: f32[1,128], index: 1, kind: input, shape index: {}]   ;;  %s1348_s2 = inlined_call_operand.vmem [shape: f32[1,128], index: 2, kind: input, shape index: {}]   ;;  %s1349_s3 = inlined_call_operand.hbm [shape: f32[128,256], index: 3, kind: input, shape index: {}]   ;;  %s1350_s4 = inlined_call_operand.vmem [shape: f32[1,256], index: 4, kind: input, shape index: {}]   ;;  %s1351_s5 = inlined_call_operand.hbm [shape: f32[256,128], index: 5, kind: input, shape index: {}]   ;;  %s1352_s6 = inlined_call_operand.vmem [shape: f32[1,128], index: 6, kind: input, shape index: {}]   ;;  %s1353_s7 = inlined_call_operand.hbm [shape: f32[16,128], index: 7, kind: output, shape index: {}]  }
   0x1   :  { %14 = vsyncpa [#allocation3 + $0x1], 0 }
   0x2   :  { %15 = vsyncpa [#allocation6], 0 }
   0x3   :  { %16 = vsyncpa [#allocation4], 0 }
   0x4   :  { %18 = vsyncpa [#allocation4 + $0x1], 0  ;;  %s1091_s24 = smov 0   ;;  %s1093_s25 = smov 0  }
   0x5   :  { %s1095_s26 = smov 0   ;;  %s1097_s27 = smov 0  }
   0x6 LB: > { %s1112_s28 = sadd.s32 4294967295, %s1040_s27   ;;  %s690_s29 = sadd.s32 4294967294, %s1040_s27   ;;  %s1040_s27 = sphi %s1097_s27, %s1373_s27   ;;  %s1036_s26 = sphi %s1095_s26, %s1372_s26   ;;  %s1032_s25 = sphi %s1093_s25, %s1371_s25   ;;  %s1028_s24 = sphi %s1091_s24, %s1370_s24  }
   0x7   : > { %p44_p0 = scmp.ne.s32.totalorder %s1032_s25, %s1028_s24  ;;  %p1354_p1 = scmp.eq.s32.totalorder %s1112_s28, 0 }
   0x8   : > { %p200_p3 = scmp.eq.s32.totalorder %s690_s29, 1  ;;  %p691_p5 = scmp.ge.s32.totalorder %s1040_s27, 1 }
   0x9   : > { %p1121_p4 = por %p1354_p1, %p44_p0  ;;  %p207_p7 = scmp.lt.s32.totalorder %s1040_s27, 3 }
   0xa   : > { %p1126_p6 = por %p200_p3, %p44_p0  ;;  %s1042_s10 = smov [#allocation5]  }
   0xb   : > { %s1357_s30 = scalar_select %p1121_p4, 1, 0 }
   0xc   : > { %s1358_s8 = scalar_select %p1126_p6, 1, 0 }
   0xd   : > { %p1131_p8 = pnand %p691_p5, %p207_p7  ;;  %s225_s11 = sshll.u32 %s1042_s10, 4  ;;  %s1135_s11 = int_to_ptr.vmem [resolvable:$true] %s225_s11 }
   0xe   : > { %s1043_s13 = smov [#allocation7]   ;;  %s884_s17 = scalar_lea.hbm %s1349_s3, 4096 }
   0xf   : > { %p820_p9 = pneg %p1131_p8  ;;  %s241_s14 = sshll.u32 %s1043_s13, 4  ;;  %s1146_s14 = int_to_ptr.vmem [resolvable:$true] %s241_s14 }
  0x10   : > { %p885_p12 = scmp.ne.s32.totalorder %s1349_s3, %s884_s17  ;;  %p891_p5 = scmp.lt.u32.totalorder %s884_s17, %s1349_s3 }
  0x11   : > { %p1142_p11 = pnand %p820_p9, %p1354_p1 }
  0x13   : > { %p886_p13 = pneg %p1142_p11 }
  0x15   : > { %p887_p0 = pnand %p886_p13, %p885_p12 }
  0x17   : > { %p888_p3 = pneg %p887_p0 }
  0x19   : > { %p893_p7 = pnand %p891_p5, %p888_p3 }
  0x1b   : > { %896 = shalt.err (!%p893_p7)
}
  0x1c   : > { %s897_s22 = scalar_lea.vmem %s1135_s11, 4096  ;;  %p905_p2 = scmp.lt.s32.totalorder %s1135_s11, %s1135_s11 }
  0x1d   : > { %p898_p9 = scmp.ne.s32.totalorder %s1135_s11, %s897_s22  ;;  %p906_p12 = scmp.lt.s32.totalorder %s897_s22, %s897_s22 }
  0x1f   : > { %p900_p10 = pnand %p898_p9, %p886_p13  ;;  %p907_p0 = por %p906_p12, %p905_p2 }
  0x21   : > { %p901_p1 = pneg %p900_p10 }
  0x23   : > { %p908_p6 = pnand %p907_p0, %p901_p1 }
  0x25   : > { %911 = shalt.err (!%p908_p6)
}
  0x26   : > { %s1044_s23 = smov 256   ;;  %s1045_s29 = smov 16  }
  0x27   : > { %823 = dma.hbm_to_vmem [thread:$0]  (!%p1142_p11), %s1349_s3, 4096, %s1135_s11, [#allocation6], %s1044_s23, %s1044_s23, %s1045_s29  }
  0x28   : > { %s912_s17 = scalar_lea.hbm %s1351_s5, 4096 }
  0x29   : > { %p913_p2 = scmp.ne.s32.totalorder %s1351_s5, %s912_s17  ;;  %p919_p10 = scmp.lt.u32.totalorder %s912_s17, %s1351_s5 }
  0x2b   : > { %p915_p1 = pnand %p913_p2, %p886_p13 }
  0x2d   : > { %p916_p6 = pneg %p915_p1 }
  0x2f   : > { %p921_p3 = pnand %p919_p10, %p916_p6 }
  0x31   : > { %924 = shalt.err (!%p921_p3)
}
  0x32   : > { %s925_s11 = scalar_lea.vmem %s1146_s14, 4096  ;;  %p933_p12 = scmp.lt.s32.totalorder %s1146_s14, %s1146_s14 }
  0x33   : > { %p926_p5 = scmp.ne.s32.totalorder %s1146_s14, %s925_s11  ;;  %p934_p0 = scmp.lt.s32.totalorder %s925_s11, %s925_s11 }
  0x35   : > { %p928_p7 = pnand %p926_p5, %p886_p13  ;;  %p935_p2 = por %p934_p0, %p933_p12 }
  0x37   : > { %p929_p9 = pneg %p928_p7 }
  0x39   : > { %p936_p1 = pnand %p935_p2, %p929_p9 }
  0x3b   : > { %939 = shalt.err (!%p936_p1)
}
  0x3c   : > { %s1046_s22 = smov 128   ;;  %s1047_s23 = smov 8  }
  0x3d   : > { %826 = dma.hbm_to_vmem [thread:$0]  (!%p1142_p11), %s1351_s5, 4096, %s1146_s14, [#allocation6], %s1046_s22, %s1046_s22, %s1047_s23  }
  0x3e   : > { %s1201_s13 = sadd.s32 1, %s1040_s27   ;;  %s31_s16 = sadd.s32 1, %s1036_s26 }
  0x3f   : > { %s28_s15 = ssub.s32 %s1040_s27, %s1201_s13  ;;  %p38_p6 = scmp.ne.s32.totalorder %s1036_s26, %s1032_s25 }
  0x40   : > { %p29_p13 = scmp.eq.s32.totalorder %s28_s15, 0  ;;  %p39_p10 = scmp.eq.s32.totalorder %s1040_s27, 0 }
  0x41   : > { %p1361_p5 = scmp.eq.s32.totalorder %s1112_s28, 1  ;;  %p837_p9 = scmp.lt.s32.totalorder %s1040_s27, 2 }
  0x42   : > { %s1210_s17 = scalar_select %p29_p13, %s1036_s26, %s31_s16  }
  0x43   : > { %p40_p3 = por %p39_p10, %p38_p6  ;;  %p1214_p7 = por %p1361_p5, %p38_p6 }
  0x44   : > { %s258_s12 = sand.u32 1, %s1036_s26   ;;  %s696_s14 = sshll.u32 %s1040_s27, 7 }
  0x45   : > { %s1362_s18 = scalar_select %p1214_p7, 1, 0 }
  0x46   : > { %s695_s19 = sshll.u32 %s258_s12, 3  ;;  %s1224_s11 = scalar_lea.hbm %s1346_s0, %s696_s14 }
  0x47   : > { %s262_s22 = scalar_lea.vmem [#allocation2], %s695_s19  ;;  %p1228_p11 = pnand %p837_p9, %p40_p3 }
  0x48   : > { %s269_s23 = sshll.u32 %s262_s22, 4  ;;  %s259_s10 = scalar_lea.sflag [#allocation3], %s258_s12  ;;  %s1226_s23 = int_to_ptr.vmem [resolvable:$true] %s269_s23 }
  0x49   : > { %s940_s15 = scalar_lea.hbm %s1224_s11, 128  ;;  %p942_p0 = pneg %p1228_p11 }
  0x4a   : > { %p941_p12 = scmp.ne.s32.totalorder %s1224_s11, %s940_s15  ;;  %s945_s14 = scalar_lea.hbm %s1346_s0, 256 }
  0x4b   : > { %p946_p13 = scmp.lt.u32.totalorder %s1224_s11, %s1346_s0  ;;  %p947_p6 = scmp.lt.u32.totalorder %s945_s14, %s940_s15 }
  0x4c   : > { %p943_p2 = pnand %p942_p0, %p941_p12  ;;  %p949_p3 = scmp.lt.u32.totalorder %s940_s15, %s1224_s11 }
  0x4d   : > { %p948_p10 = por %p947_p6, %p946_p13 }
  0x4e   : > { %p944_p1 = pneg %p943_p2 }
  0x4f   : > { %p950_p5 = por %p949_p3, %p948_p10 }
  0x51   : > { %p951_p9 = pnand %p950_p5, %p944_p1 }
  0x53   : > { %954 = shalt.err (!%p951_p9)
}
  0x54   : > { %s955_s12 = scalar_lea.vmem %s1226_s23, 128  ;;  %s1048_s22 = smov [#allocation2]  }
  0x55   : > { %p956_p12 = scmp.ne.s32.totalorder %s1226_s23, %s955_s12  ;;  %s960_s16 = sshll.u32 %s1048_s22, 4  ;;  %s961_s16 = int_to_ptr.vmem [resolvable:$false] %s960_s16 }
  0x56   : > { %s962_s19 = scalar_lea.vmem %s961_s16, 256  ;;  %p963_p4 = scmp.lt.s32.totalorder %s1226_s23, %s961_s16 }
  0x57   : > { %p958_p2 = pnand %p956_p12, %p942_p0  ;;  %p964_p13 = scmp.lt.s32.totalorder %s962_s19, %s955_s12 }
  0x59   : > { %p959_p7 = pneg %p958_p2  ;;  %p965_p6 = por %p964_p13, %p963_p4 }
  0x5b   : > { %p966_p10 = pnand %p965_p6, %p959_p7 }
  0x5d   : > { %969 = shalt.err (!%p966_p10)
}
  0x5e   : > { %830 = dma.hbm_to_vmem [thread:$0]  (!%p1228_p11), %s1224_s11, 128, %s1226_s23, %s259_s10  }
  0x5f   : > { %278 = sbr.rel (%p1131_p8) target bundleno = 882 (0x372), region = 48  ;;  %s1260_s15 = sand.u32 (!%p1131_p8), 1, %s1032_s25  }
  0x60   : > { %s698_s14 = sshll.u32 (!%p1131_p8), %s1260_s15, 3  ;;  %s281_s20 = scalar_lea.sflag (!%p1131_p8), [#allocation3], %s1260_s15 }
  0x61   : > { %s284_s21 = scalar_lea.vmem (!%p1131_p8), [#allocation2], %s698_s14  ;;  %p1364_p4 = scmp.ne.s32.totalorder (!%p1131_p8), %s1357_s30, 0 }
  0x66   : > { %1015 = dma.done.wait (%p1364_p4), %s281_s20, 128  }
  0x67   : > { %1017 = vsyncadd (%p1364_p4), %s281_s20, 4294967168  ;;  %p1365_p7 = scmp.eq.s32.totalorder %s1112_s28, 0 }
  0x69   : > { %1019 = dma.done.wait (%p1365_p7), [#allocation6], 8192   ;;  %p1366_p8 = pmov %p1365_p7 }
  0x6a   : > { %v1274_v0 = vld [vmem:[%s284_s21] sm:$0xff]  ;;  %v360_v5 = vld [vmem:[#allocation5 + $0x8] sm:$0xff]  ;;  %v359_v8 = vld [vmem:[#allocation5] sm:$0xff]  ;;  %v1049_v36 = vmov 0.0   ;;  %s706_s16 = sshll.u32 %s1112_s28, 7  ;;  %s322_s19 = scalar_lea.vmem [#allocation8], %s698_s14 }
  0x6b   : > { %1021 = vsyncadd (%p1366_p8), [#allocation6], 4294959104  ;;  %326 = vadd.xlane.f32.xlu0 %v1274_v0  ;;  %v362_v6 = vld [vmem:[#allocation5 + $0x18] sm:$0xff]  ;;  %v361_v9 = vld [vmem:[#allocation5 + $0x10] sm:$0xff]  ;;  %467 = vmatprep.mubr.f32.mxu0 %v1049_v36  ;;  %s601_s20 = sshll.u32 %s322_s19, 4  ;;  %s1302_s9 = scalar_lea.hbm %s1353_s7, %s706_s16  ;;  %s1304_s20 = int_to_ptr.vmem [resolvable:$true] %s601_s20 }
  0x6c   : > { %v744_v7 = vpack.c.bf16 %v362_v6, %v360_v5  ;;  %v746_v10 = vpack.c.bf16 %v361_v9, %v359_v8  ;;  %v364_v11 = vld [vmem:[#allocation5 + $0x28] sm:$0xff]  ;;  %v366_v12 = vld [vmem:[#allocation5 + $0x38] sm:$0xff]  ;;  %v363_v14 = vld [vmem:[#allocation5 + $0x20] sm:$0xff]  ;;  %s588_s11 = scalar_lea.sflag [#allocation4], %s1260_s15  ;;  %s970_s23 = scalar_lea.vmem %s1304_s20, 128 }
  0x6d   : > { %v748_v13 = vpack.c.bf16 %v366_v12, %v364_v11  ;;  %v365_v15 = vld [vmem:[#allocation5 + $0x30] sm:$0xff]  ;;  %v368_v17 = vld [vmem:[#allocation5 + $0x48] sm:$0xff]  ;;  %v370_v18 = vld [vmem:[#allocation5 + $0x58] sm:$0xff]  ;;  %p971_p11 = scmp.ne.s32.totalorder %s1304_s20, %s970_s23  ;;  %p1367_p0 = scmp.ne.s32.totalorder %s1362_s18, 0 }
  0x6e   : > { %745 = vmatprep.subr.bf16.mxu0 %v744_v7  ;;  %v750_v16 = vpack.c.bf16 %v365_v15, %v363_v14  ;;  %v752_v19 = vpack.c.bf16 %v370_v18, %v368_v17  ;;  %v367_v20 = vld [vmem:[#allocation5 + $0x40] sm:$0xff]  ;;  %v369_v21 = vld [vmem:[#allocation5 + $0x50] sm:$0xff]  ;;  %v372_v23 = vld [vmem:[#allocation5 + $0x68] sm:$0xff]  ;;  %s1050_s28 = smov [#allocation8]  }
  0x6f   : > { %747 = vmatpush1.bf16.msra.mxu0 %v746_v10  ;;  %v754_v22 = vpack.c.bf16 %v369_v21, %v367_v20  ;;  %v374_v24 = vld [vmem:[#allocation5 + $0x78] sm:$0xff]  ;;  %v371_v26 = vld [vmem:[#allocation5 + $0x60] sm:$0xff]  ;;  %v373_v27 = vld [vmem:[#allocation5 + $0x70] sm:$0xff]  ;;  %p972_p1 = pnand %p971_p11, %p1367_p0  ;;  %s974_s14 = sshll.u32 %s1050_s28, 4  ;;  %s975_s14 = int_to_ptr.vmem [resolvable:$false] %s974_s14 }
  0x70   : > { %749 = vmatprep.subr.bf16.mxu0 %v748_v13  ;;  %v756_v25 = vpack.c.bf16 %v374_v24, %v372_v23  ;;  %v758_v28 = vpack.c.bf16 %v373_v27, %v371_v26  ;;  %v376_v29 = vld [vmem:[#allocation5 + $0x88] sm:$0xff]  ;;  %v378_v30 = vld [vmem:[#allocation5 + $0x98] sm:$0xff]  ;;  %v375_v31 = vld [vmem:[#allocation5 + $0x80] sm:$0xff]  ;;  %s976_s29 = scalar_lea.vmem %s975_s14, 256  ;;  %p977_p5 = scmp.lt.s32.totalorder %s1304_s20, %s975_s14 }
  0x71   : > { %v760_v32 = vpack.c.bf16 %v378_v30, %v376_v29  ;;  %v377_v33 = vld [vmem:[#allocation5 + $0x90] sm:$0xff]  ;;  %v380_v34 = vld [vmem:[#allocation5 + $0xa8] sm:$0xff]  ;;  %v382_v35 = vld [vmem:[#allocation5 + $0xb8] sm:$0xff]  ;;  %p973_p3 = pneg %p972_p1  ;;  %p978_p9 = scmp.lt.s32.totalorder %s976_s29, %s970_s23 }
  0x72   : > { %v762_v37 = vpack.c.bf16 %v377_v33, %v375_v31  ;;  %v764_v38 = vpack.c.bf16 %v382_v35, %v380_v34  ;;  %v379_v39 = vld [vmem:[#allocation5 + $0xa0] sm:$0xff]  ;;  %v381_v40 = vld [vmem:[#allocation5 + $0xb0] sm:$0xff]  ;;  %v384_v41 = vld [vmem:[#allocation5 + $0xc8] sm:$0xff] }
  0x73   : > { %751 = vmatpush1.bf16.msra.mxu0 %v750_v16  ;;  %v386_v42 = vld [vmem:[#allocation5 + $0xd8] sm:$0xff]  ;;  %v766_v43 = vpack.c.bf16 %v381_v40, %v379_v39  ;;  %v383_v45 = vld [vmem:[#allocation5 + $0xc0] sm:$0xff]  ;;  %v385_v46 = vld [vmem:[#allocation5 + $0xd0] sm:$0xff]  ;;  %p979_p12 = por %p978_p9, %p977_p5 }
  0x74   : > { %753 = vmatprep.subr.bf16.mxu0 %v752_v19  ;;  %v768_v44 = vpack.c.bf16 %v386_v42, %v384_v41  ;;  %v388_v47 = vld [vmem:[#allocation5 + $0xe8] sm:$0xff]  ;;  %v390_v48 = vld [vmem:[#allocation5 + $0xf8] sm:$0xff]  ;;  %v770_v49 = vpack.c.bf16 %v385_v46, %v383_v45  ;;  %v387_v51 = vld [vmem:[#allocation5 + $0xe0] sm:$0xff] }
  0x75   : > { %v772_v50 = vpack.c.bf16 %v390_v48, %v388_v47  ;;  %v389_v52 = vld [vmem:[#allocation5 + $0xf0] sm:$0xff]  ;;  %v492_v54 = vld [vmem:[#allocation7 + $0x80] sm:$0xff]  ;;  %v493_v55 = vld [vmem:[#allocation7 + $0x88] sm:$0xff]  ;;  %p980_p2 = pnand %p979_p12, %p973_p3 }
  0x76   : > { %v774_v53 = vpack.c.bf16 %v389_v52, %v387_v51  ;;  %v476_v56 = vld [vmem:[#allocation7] sm:$0xff]  ;;  %v776_v57 = vpack.c.bf16 %v493_v55, %v492_v54  ;;  %v477_v58 = vld [vmem:[#allocation7 + $0x8] sm:$0xff]  ;;  %v494_v59 = vld [vmem:[#allocation7 + $0x90] sm:$0xff] }
  0x77   : > { %755 = vmatpush1.bf16.msra.mxu0 %v754_v22  ;;  %v495_v60 = vld [vmem:[#allocation7 + $0x98] sm:$0xff]  ;;  %v778_v61 = vpack.c.bf16 %v477_v58, %v476_v56  ;;  %v478_v63 = vld [vmem:[#allocation7 + $0x10] sm:$0xff]  ;;  %v480_v7 = vld [vmem:[#allocation7 + $0x20] sm:$0xff] }
  0x78   : > { %757 = vmatprep.subr.bf16.mxu0 %v756_v25  ;;  %v780_v62 = vpack.c.bf16 %v495_v60, %v494_v59  ;;  %777 = vmatprep.subr.bf16.mxu1 %v776_v57  ;;  %v481_v8 = vld [vmem:[#allocation7 + $0x28] sm:$0xff]  ;;  %v498_v9 = vld [vmem:[#allocation7 + $0xb0] sm:$0xff]  ;;  %v499_v10 = vld [vmem:[#allocation7 + $0xb8] sm:$0xff] }
  0x79   : > { %779 = vmatpush3.bf16.msra.mxu1 %v778_v61  ;;  %v786_v11 = vpack.c.bf16 %v481_v8, %v480_v7  ;;  %v788_v12 = vpack.c.bf16 %v499_v10, %v498_v9  ;;  %v482_v13 = vld [vmem:[#allocation7 + $0x30] sm:$0xff]  ;;  %v483_v14 = vld [vmem:[#allocation7 + $0x38] sm:$0xff]  ;;  %v500_v15 = vld [vmem:[#allocation7 + $0xc0] sm:$0xff] }
  0x7a   : > { %781 = vmatprep.subr.bf16.mxu1 %v780_v62  ;;  %v501_v16 = vld [vmem:[#allocation7 + $0xc8] sm:$0xff]  ;;  %v790_v17 = vpack.c.bf16 %v483_v14, %v482_v13  ;;  %v484_v19 = vld [vmem:[#allocation7 + $0x40] sm:$0xff]  ;;  %v502_v21 = vld [vmem:[#allocation7 + $0xd0] sm:$0xff] }
  0x7b   : > { %759 = vmatpush1.bf16.msra.mxu0 %v758_v28  ;;  %v792_v18 = vpack.c.bf16 %v501_v16, %v500_v15  ;;  %v485_v20 = vld [vmem:[#allocation7 + $0x48] sm:$0xff]  ;;  %v503_v22 = vld [vmem:[#allocation7 + $0xd8] sm:$0xff]  ;;  %v486_v25 = vld [vmem:[#allocation7 + $0x50] sm:$0xff] }
  0x7c   : > { %761 = vmatprep.subr.bf16.mxu0 %v760_v32  ;;  %v794_v23 = vpack.c.bf16 %v485_v20, %v484_v19  ;;  %v796_v24 = vpack.c.bf16 %v503_v22, %v502_v21  ;;  %v487_v26 = vld [vmem:[#allocation7 + $0x58] sm:$0xff]  ;;  %v504_v27 = vld [vmem:[#allocation7 + $0xe0] sm:$0xff]  ;;  %v505_v28 = vld [vmem:[#allocation7 + $0xe8] sm:$0xff] }
  0x7d   : > { %v798_v29 = vpack.c.bf16 %v487_v26, %v486_v25  ;;  %v800_v30 = vpack.c.bf16 %v505_v28, %v504_v27  ;;  %v702_v39 = vld [vmem:[%s1347_s1] ss:$0 sm:$0xff]  ;;  %v488_v45 = vld [vmem:[#allocation7 + $0x60] sm:$0xff]  ;;  %v489_v46 = vld [vmem:[#allocation7 + $0x68] sm:$0xff] }
  0x7e   : > { %v703_v42 = vld [vmem:[%s1348_s2] ss:$0 sm:$0xff]  ;;  %v802_v47 = vpack.c.bf16 %v489_v46, %v488_v45  ;;  %v491_v52 = vld [vmem:[#allocation7 + $0x78] sm:$0xff] }
  0x7f   : > { %763 = vmatpush1.bf16.msra.mxu0 %v762_v37  ;;  %v506_v48 = vld [vmem:[#allocation7 + $0xf0] sm:$0xff] }
  0x80   : > { %765 = vmatprep.subr.bf16.mxu0 %v764_v38  ;;  %v490_v51 = vld [vmem:[#allocation7 + $0x70] sm:$0xff] }
  0x81   : > { %v391_v56 = vld [vmem:[%s1350_s4] sm:$0x3] }
  0x83   : > { %767 = vmatpush1.bf16.msra.mxu0 %v766_v43 }
  0x84   : > { %769 = vmatprep.subr.bf16.mxu0 %v768_v44 }
  0x87   : > { %771 = vmatpush1.bf16.msra.mxu0 %v770_v49  ;;  %v507_v49 = vld [vmem:[#allocation7 + $0xf8] sm:$0xff] }
  0x88   : > { %773 = vmatprep.subr.bf16.mxu0 %v772_v50  ;;  %v804_v50 = vpack.c.bf16 %v507_v49, %v506_v48 }
  0x8b   : > { %775 = vmatpush1.bf16.msra.mxu0 %v774_v53  ;;  %v806_v53 = vpack.c.bf16 %v491_v52, %v490_v51 }
  0xf8   : > { %v327_v1 = vpop.xlane.xlu0 %326 }
  0xf9   : > { %v329_v2 = vmul.f32 0.0078125, %v327_v1  ;;  %v479_v1 = vld [vmem:[#allocation7 + $0x18] sm:$0xff] }
  0xfa   : > { %v782_v5 = vpack.c.bf16 %v479_v1, %v478_v63 }
  0xfb   : > { %v1278_v3 = vsub.f32 %v1274_v0, %v329_v2  ;;  %v496_v2 = vld [vmem:[#allocation7 + $0xa0] sm:$0xff] }
  0xfc   : > { %783 = vmatpush3.bf16.msra.mxu1 %v782_v5  ;;  %v704_v5 = vld [vmem:[%s1352_s6] ss:$0 sm:$0xff] }
  0xfd   : > { %v331_v4 = vmul.f32 %v1278_v3, %v1278_v3  ;;  %v350_v40 = vmul.f32 %v702_v39, %v1278_v3  ;;  %v393_v3 = vlaneseq }
  0xff   : > { %332 = vadd.xlane.f32.xlu0 %v331_v4  ;;  %v497_v4 = vld [vmem:[#allocation7 + $0xa8] sm:$0xff]  ;;  %v394_v54 = vshrl.u32 %v393_v3, 7 }
 0x100   : > { %v784_v6 = vpack.c.bf16 %v497_v4, %v496_v2 }
 0x101   : > { %v395_v55 = vsub.s32 0, %v394_v54  ;;  %v399_v57 = vsub.s32 1, %v394_v54 }
 0x102   : > { %785 = vmatprep.subr.bf16.mxu1 %v784_v6 }
 0x103   : > { %787 = vmatpush3.bf16.msra.mxu1 %v786_v11  ;;  %v396_v58 = vrot.slane %v391_v56, %v395_v55  ;;  %v400_v59 = vrot.slane %v391_v56, %v399_v57 }
 0x104   : > { %789 = vmatprep.subr.bf16.mxu1 %v788_v12 }
 0x107   : > { %791 = vmatpush3.bf16.msra.mxu1 %v790_v17 }
 0x108   : > { %793 = vmatprep.subr.bf16.mxu1 %v792_v18 }
 0x10b   : > { %795 = vmatpush3.bf16.msra.mxu1 %v794_v23 }
 0x10c   : > { %797 = vmatprep.subr.bf16.mxu1 %v796_v24 }
 0x10f   : > { %799 = vmatpush3.bf16.msra.mxu1 %v798_v29 }
 0x110   : > { %801 = vmatprep.subr.bf16.mxu1 %v800_v30 }
 0x113   : > { %803 = vmatpush3.bf16.msra.mxu1 %v802_v47 }
 0x114   : > { %805 = vmatprep.subr.bf16.mxu1 %v804_v50 }
 0x117   : > { %807 = vmatpush3.bf16.msra.mxu1 %v806_v53 }
 0x18c   : > { %v333_v31 = vpop.xlane.xlu0 %332 }
 0x18d   : > { %v334_v32 = vmul.f32 0.007874016, %v333_v31 }
 0x18f   : > { %880 = vrsqrt.f32 %v334_v32  ;;  %vm337_vm0 = vcmp.eq.f32.partialorder %v334_v32, inf  ;;  %v340_v35 = vand.u32 2147483648, %v334_v32  ;;  %vm339_vm1 = vcmp.eq.f32.partialorder %v334_v32, 0.0 }
 0x199   : > { %v881_v33 = vpop.eup %880 }
 0x19a   : > { %v336_v34 = vmul.f32 %v881_v33, %v334_v32 }
 0x19c   : > { %v338_v36 = vsel %vm337_vm0, %v334_v32, %v336_v34 }
 0x19d   : > { %v341_v37 = vsel %vm339_vm1, %v340_v35, %v338_v36 }
 0x19e   : > { %v342_v38 = vadd.f32 1e-06, %v341_v37 }
 0x1a0   : > { %882 = vrcp.f32 %v342_v38 }
 0x1aa   : > { %v883_v41 = vpop.eup %882 }
 0x1ab   : > { %v351_v43 = vmul.f32 %v883_v41, %v350_v40 }
 0x1ad   : > { %v358_v44 = vadd.f32 %v703_v42, %v351_v43 }
 0x1af   : > { %468 = vmatmul.mubr.f32.vlgmr.msra.gmra.mrb[0].mxu0 %v358_v44 }
 0x282   : > { %v469_v60 = vpop.f32.mrb[0].mxu0 }
 0x283   : > { %v470_v61 = vadd.f32 %v469_v60, %v396_v58  ;;  %v471_v62 = vpop.f32.mrb[1].mxu0 }
 0x284   : > { %v472_v63 = vadd.f32 %v471_v62, %v400_v59 }
 0x285   : > { %v474_v2 = vmax.f32 %v470_v61, 0.0 }
 0x286   : > { %v475_v1 = vmax.f32 %v472_v63, 0.0 }
 0x288   : > { %579 = vmatprep.mubr.f32.mxu1 %v475_v1 }
 0x289   : > { %580 = vmatmul.mubr.f32.vlgmr.msra.gmra.mrb[0].mxu1 %v474_v2 }
 0x35c   : > { %v741_v4 = vpop.f32.mrb[0].mxu1 }
 0x35d   : > { %v742_v6 = vpop.f32.mrb[1].mxu1 }
 0x35e   : > { %v743_v7 = vadd.f32 %v742_v6, %v741_v4 }
 0x360   : > { %v582_v8 = vadd.f32 %v743_v7, %v704_v5 }
 0x362   : > { %v585_v9 = vadd.f32 %v582_v8, %v1274_v0 }
 0x364   : > { %586 = vst [vmem:[%s322_s19] sm:$0xff] %v585_v9 }
 0x365   : > { %983 = shalt.err (!%p980_p2)
}
 0x366   : > { %s984_s15 = scalar_lea.hbm %s1302_s9, 128  ;;  %s988_s22 = scalar_lea.hbm %s1353_s7, 256 }
 0x367   : > { %p985_p13 = scmp.ne.s32.totalorder %s1302_s9, %s984_s15  ;;  %p989_p4 = scmp.lt.u32.totalorder %s1302_s9, %s1353_s7 }
 0x368   : > { %p990_p7 = scmp.lt.u32.totalorder %s988_s22, %s984_s15  ;;  %p992_p11 = scmp.lt.u32.totalorder %s984_s15, %s1302_s9 }
 0x369   : > { %p986_p6 = pnand %p985_p13, %p1367_p0 }
 0x36a   : > { %p991_p8 = por %p990_p7, %p989_p4 }
 0x36b   : > { %p987_p10 = pneg %p986_p6 }
 0x36c   : > { %p993_p1 = por %p992_p11, %p991_p8 }
 0x36e   : > { %p994_p3 = pnand %p993_p1, %p987_p10 }
 0x370   : > { %997 = shalt.err (!%p994_p3)
}
 0x371   : > { %818 = dma.vmem_to_hbm [thread:$0]  (%p1367_p0), %s1304_s20, 128, %s1302_s9, %s588_s11  }
 0x372 PF: > { %s613_s21 = sand.u32 1, %s1028_s24   ;;  %p1368_p5 = scmp.ne.s32.totalorder %s1358_s8, 0 }
 0x373   : > { %p1369_p9 = scmp.ge.s32.totalorder %s1040_s27, 2  ;;  %s614_s30 = scalar_lea.sflag [#allocation4], %s613_s21 }
 0x375   : > { %p832_p12 = pnand %p1369_p9, %p1368_p5 }
 0x377   : > { %1023 = dma.done.wait (!%p832_p12), %s614_s30, 128  }
 0x378   : > { %1025 = vsyncadd (!%p832_p12), %s614_s30, 4294967168  ;;  %p21_p2 = scmp.ge.s32.totalorder %s1201_s13, 4   ;;  %s1370_s24 = smov %s1032_s25 }
 0x379   : > { %s1371_s25 = smov %s1036_s26  ;;  %s1372_s26 = smov %s1210_s17 }
 0x37a   : > { %s1373_s27 = smov %s1201_s13  ;;  %23 = sbr.rel (!%p21_p2) target bundleno = 6 (0x6), region = 101 }
 0x381   :  { %619 = vsyncpa [#allocation3], 1 }
 0x382   :  { %621 = vsyncpa [#allocation3 + $0x1], 1 }
 0x383   :  { %622 = vsyncpa [#allocation6], 1 }
 0x384   :  { %623 = vsyncpa [#allocation4], 1 }
 0x385   :  { %625 = vsyncpa [#allocation4 + $0x1], 1 }

</bundles_post_ra>
